<compile_context>
chip_gen: v7x
topology: tpu7x:2x2x1
jax: 0.10.0
libtpu: 0.0.40
codegen_flags: <defaults>
</compile_context>

<pallas_src>
import jax
import jax.numpy as jnp
import numpy as np
from jax.experimental import pallas as pl
from jax.experimental.pallas import tpu as pltpu


def basic_block_kernel(x_ref, m1_ref, m2_ref, o_ref):
    """One batch image: out = ReLU(conv2(ReLU(conv1(x))) + x).

    x_ref : (1, H, W*C)   float32   activations, lane index = w*C + c
    m*_ref: (3, W*C, W*C) bfloat16  banded per-kernel-row conv matrices
    o_ref : (1, H, W*C)   float32
    """
    x = x_ref[0]                                  # (H, WC) f32
    H = x.shape[0]

    # Exact 0/1 row-shift matrices (implement the conv's zero padding along H):
    #   (s_up @ a)[h] == a[h-1]  (zero row for h == 0)
    #   (s_dn @ a)[h] == a[h+1]  (zero row for h == H-1)
    r = jax.lax.broadcasted_iota(jnp.int32, (H, H), 0)
    c = jax.lax.broadcasted_iota(jnp.int32, (H, H), 1)
    s_up = jnp.where(c == r - 1, 1.0, 0.0).astype(jnp.bfloat16)
    s_dn = jnp.where(c == r + 1, 1.0, 0.0).astype(jnp.bfloat16)

    def conv3x3(a_f32, m_ref):
        """SAME 3x3 conv of a (H, W*Cin) activation -> (H, W*Cout) f32."""
        a = a_f32.astype(jnp.bfloat16)
        # Row shifts via MXU (exact: a single 0/1 term per output element).
        a_up = jnp.dot(s_up, a, preferred_element_type=jnp.float32).astype(jnp.bfloat16)
        a_dn = jnp.dot(s_dn, a, preferred_element_type=jnp.float32).astype(jnp.bfloat16)
        acc = jnp.dot(a_up, m_ref[0], preferred_element_type=jnp.float32)
        acc += jnp.dot(a, m_ref[1], preferred_element_type=jnp.float32)
        acc += jnp.dot(a_dn, m_ref[2], preferred_element_type=jnp.float32)
        return acc

    out1 = jnp.maximum(conv3x3(x, m1_ref), 0.0)          # conv1 + ReLU
    out2 = conv3x3(out1, m2_ref)                          # conv2 (no act)
    o_ref[0] = jnp.maximum(out2 + x, 0.0).astype(o_ref.dtype)  # +residual, ReLU
    # TODO(synk): act_quantizer / weight-quant branches are identity at the
    # module defaults (use_act_quant=False, use_weight_quant=False); the
    # downsample branch is None for this BasicBlock configuration.


def _lower_conv3x3(w_hwio, width):
    """Lower HWIO 3x3 weights to per-kernel-row banded matmul matrices.

    Returns M of shape (3, W*Cin, W*Cout) with
        M[dh, w_in*Cin + ci, w_out*Cout + co] = w_hwio[dh, w_in - w_out + 1, ci, co]
    (zero outside the 3-wide band), so that with activations laid out as rows
    (H, W*Cin):   out[h] = sum_dh  act_zero_padded[h + dh - 1] @ M[dh].
    The dw taps, channel mixing and width zero-padding are all folded into one
    fat contraction per kernel row.
    """
    kh, kw, cin, cout = w_hwio.shape
    w_in = jnp.arange(width)[:, None]
    w_out = jnp.arange(width)[None, :]
    dw = w_in - w_out + 1                                     # (W, W)
    valid = (dw >= 0) & (dw < kw)
    taps = w_hwio[:, jnp.clip(dw, 0, kw - 1), :, :]           # (3, W, W, Cin, Cout)
    taps = jnp.where(valid[None, :, :, None, None], taps, 0.0)
    return jnp.transpose(taps, (0, 1, 3, 2, 4)).reshape(kh, width * cin, width * cout)


@jax.jit
def quant_basic_block(x_nhwc, w1_hwio, w2_hwio):
    """x_nhwc: (B, H, W, C) float32; w1/w2: (3, 3, C, C) HWIO float32."""
    B, H, W, C = x_nhwc.shape
    WC = W * C                                  # lane axis (128 for test shapes)
    x2d = x_nhwc.reshape(B, H, WC)              # free reshape -> lane-dense layout

    # Weight prep (once per call, pure-JAX glue): band-lower + cast to bf16.
    m1 = _lower_conv3x3(w1_hwio, W).astype(jnp.bfloat16)
    m2 = _lower_conv3x3(w2_hwio, W).astype(jnp.bfloat16)

    out2d = pl.pallas_call(
        basic_block_kernel,
        out_shape=jax.ShapeDtypeStruct((B, H, WC), x_nhwc.dtype),
        grid_spec=pltpu.PrefetchScalarGridSpec(
            num_scalar_prefetch=0,
            grid=(B,),
            in_specs=[
                pl.BlockSpec((1, H, WC), lambda b: (b, 0, 0)),
                pl.BlockSpec((3, WC, WC), lambda b: (0, 0, 0)),
                pl.BlockSpec((3, WC, WC), lambda b: (0, 0, 0)),
            ],
            out_specs=pl.BlockSpec((1, H, WC), lambda b: (b, 0, 0)),
        ),
        compiler_params=pltpu.CompilerParams(
            dimension_semantics=("parallel",)),   # batch images are independent
    )(x2d, m1, m2)
    return out2d.reshape(B, H, W, C)


def _ref_forward(x_nhwc, w1, w2):
    """Pure-JAX f32 reference of the BasicBlock forward (quant disabled)."""
    conv = lambda x, w: jax.lax.conv_general_dilated(
        x, w, window_strides=(1, 1), padding="SAME",
        dimension_numbers=("NHWC", "HWIO", "NHWC"))
    out = jax.nn.relu(conv(x_nhwc, w1))
    out = conv(out, w2)
    return jax.nn.relu(out + x_nhwc)


if __name__ == "__main__":
    # Small shapes consistent with the module: in_ch == out_ch, stride 1
    # (downsample=None).  W*C = 128 -> fully lane-dense.
    B, C, H, W = 2, 8, 16, 16

    key = jax.random.PRNGKey(0)
    kx, k1, k2 = jax.random.split(key, 3)
    # PyTorch-style NCHW input -> NHWC for the kernel (layout glue only).
    x_nchw = jax.random.normal(kx, (B, C, H, W), jnp.float32)
    x_nhwc = jnp.transpose(x_nchw, (0, 2, 3, 1))

    # PyTorch OIHW conv weights -> HWIO.
    w1_oihw = 0.1 * jax.random.normal(k1, (C, C, 3, 3), jnp.float32)
    w2_oihw = 0.1 * jax.random.normal(k2, (C, C, 3, 3), jnp.float32)
    w1 = jnp.transpose(w1_oihw, (2, 3, 1, 0))    # (3, 3, Cin, Cout)
    w2 = jnp.transpose(w2_oihw, (2, 3, 1, 0))

    out = jax.block_until_ready(quant_basic_block(x_nhwc, w1, w2))
    ref = jax.block_until_ready(_ref_forward(x_nhwc, w1, w2))

    # bf16 matmul operands vs f32 reference -> loosened tolerance.
    np.testing.assert_allclose(np.asarray(out), np.asarray(ref),
                               rtol=5e-2, atol=5e-2)

    print("KERNEL_OK")
</pallas_src>

<mosaic_0001>
module attributes {stable_mosaic.version = 11 : i64} {
  func.func @basic_block_kernel(%arg0: i32, %arg1: memref<1x16x128xf32, #tpu.memory_space<vmem>>, %arg2: memref<3x128x128xbf16, #tpu.memory_space<vmem>>, %arg3: memref<3x128x128xbf16, #tpu.memory_space<vmem>>, %arg4: memref<1x16x128xf32, #tpu.memory_space<vmem>>) attributes {dimension_semantics = [#tpu.dimension_semantics<parallel>], iteration_bounds = array<i64: 2>, scalar_prefetch = 0 : i64, scratch_operands = 0 : i64, tpu.core_type = #tpu.core_type<tc>, window_params = [{transform_indices = @transform_0, window_bounds = array<i64: 1, 16, 128>}, {pipeline_mode = #tpu.pipeline_mode<synchronous>, transform_indices = @transform_1, window_bounds = array<i64: 3, 128, 128>}, {pipeline_mode = #tpu.pipeline_mode<synchronous>, transform_indices = @transform_2, window_bounds = array<i64: 3, 128, 128>}, {transform_indices = @transform_3, window_bounds = array<i64: 1, 16, 128>}]} {
    %c0 = arith.constant 0 : index
    %c0_0 = arith.constant 0 : index
    %c0_1 = arith.constant 0 : index
    %0 = vector.load %arg1[%c0, %c0_0, %c0_1] : memref<1x16x128xf32, #tpu.memory_space<vmem>>, vector<1x16x128xf32>
    %1 = vector.shape_cast %0 : vector<1x16x128xf32> to vector<16x128xf32>
    %2 = tpu.iota {dimensions = array<i32: 0>} : vector<16x16xi32>
    %3 = tpu.iota {dimensions = array<i32: 1>} : vector<16x16xi32>
    %c1_i32 = arith.constant 1 : i32
    %4 = vector.broadcast %c1_i32 : i32 to vector<16x16xi32>
    %5 = arith.subi %2, %4 : vector<16x16xi32>
    %6 = arith.cmpi eq, %3, %5 : vector<16x16xi32>
    %cst = arith.constant 1.000000e+00 : f32
    %cst_2 = arith.constant 0.000000e+00 : f32
    %7 = vector.broadcast %cst : f32 to vector<16x16xf32>
    %8 = vector.broadcast %cst_2 : f32 to vector<16x16xf32>
    %9 = arith.select %6, %7, %8 : vector<16x16xi1>, vector<16x16xf32>
    %10 = arith.truncf %9 : vector<16x16xf32> to vector<16x16xbf16>
    %c1_i32_3 = arith.constant 1 : i32
    %11 = vector.broadcast %c1_i32_3 : i32 to vector<16x16xi32>
    %12 = arith.addi %2, %11 : vector<16x16xi32>
    %13 = arith.cmpi eq, %3, %12 : vector<16x16xi32>
    %cst_4 = arith.constant 1.000000e+00 : f32
    %cst_5 = arith.constant 0.000000e+00 : f32
    %14 = vector.broadcast %cst_4 : f32 to vector<16x16xf32>
    %15 = vector.broadcast %cst_5 : f32 to vector<16x16xf32>
    %16 = arith.select %13, %14, %15 : vector<16x16xi1>, vector<16x16xf32>
    %17 = arith.truncf %16 : vector<16x16xf32> to vector<16x16xbf16>
    %18 = arith.truncf %1 : vector<16x128xf32> to vector<16x128xbf16>
    %cst_6 = arith.constant dense<0.000000e+00> : vector<16x128xf32>
    %19 = tpu.matmul %10, %18, %cst_6 {dimension_numbers = #tpu.dot_dimension_numbers<[1], [0], [0], [1], [0, 0, 1, 1], [], []>} : vector<16x16xbf16>, vector<16x128xbf16>, vector<16x128xf32> -> vector<16x128xf32>
    %20 = arith.truncf %19 : vector<16x128xf32> to vector<16x128xbf16>
    %cst_7 = arith.constant dense<0.000000e+00> : vector<16x128xf32>
    %21 = tpu.matmul %17, %18, %cst_7 {dimension_numbers = #tpu.dot_dimension_numbers<[1], [0], [0], [1], [0, 0, 1, 1], [], []>} : vector<16x16xbf16>, vector<16x128xbf16>, vector<16x128xf32> -> vector<16x128xf32>
    %22 = arith.truncf %21 : vector<16x128xf32> to vector<16x128xbf16>
    %c0_8 = arith.constant 0 : index
    %c0_9 = arith.constant 0 : index
    %c0_10 = arith.constant 0 : index
    %23 = vector.load %arg2[%c0_8, %c0_9, %c0_10] : memref<3x128x128xbf16, #tpu.memory_space<vmem>>, vector<1x128x128xbf16>
    %24 = vector.shape_cast %23 : vector<1x128x128xbf16> to vector<128x128xbf16>
    %cst_11 = arith.constant dense<0.000000e+00> : vector<16x128xf32>
    %25 = tpu.matmul %20, %24, %cst_11 {dimension_numbers = #tpu.dot_dimension_numbers<[1], [0], [0], [1], [0, 0, 1, 1], [], []>} : vector<16x128xbf16>, vector<128x128xbf16>, vector<16x128xf32> -> vector<16x128xf32>
    %c1 = arith.constant 1 : index
    %c0_12 = arith.constant 0 : index
    %c0_13 = arith.constant 0 : index
    %26 = vector.load %arg2[%c1, %c0_12, %c0_13] : memref<3x128x128xbf16, #tpu.memory_space<vmem>>, vector<1x128x128xbf16>
    %27 = vector.shape_cast %26 : vector<1x128x128xbf16> to vector<128x128xbf16>
    %cst_14 = arith.constant dense<0.000000e+00> : vector<16x128xf32>
    %28 = tpu.matmul %18, %27, %cst_14 {dimension_numbers = #tpu.dot_dimension_numbers<[1], [0], [0], [1], [0, 0, 1, 1], [], []>} : vector<16x128xbf16>, vector<128x128xbf16>, vector<16x128xf32> -> vector<16x128xf32>
    %29 = arith.addf %25, %28 : vector<16x128xf32>
    %c2 = arith.constant 2 : index
    %c0_15 = arith.constant 0 : index
    %c0_16 = arith.constant 0 : index
    %30 = vector.load %arg2[%c2, %c0_15, %c0_16] : memref<3x128x128xbf16, #tpu.memory_space<vmem>>, vector<1x128x128xbf16>
    %31 = vector.shape_cast %30 : vector<1x128x128xbf16> to vector<128x128xbf16>
    %cst_17 = arith.constant dense<0.000000e+00> : vector<16x128xf32>
    %32 = tpu.matmul %22, %31, %cst_17 {dimension_numbers = #tpu.dot_dimension_numbers<[1], [0], [0], [1], [0, 0, 1, 1], [], []>} : vector<16x128xbf16>, vector<128x128xbf16>, vector<16x128xf32> -> vector<16x128xf32>
    %33 = arith.addf %29, %32 : vector<16x128xf32>
    %cst_18 = arith.constant 0.000000e+00 : f32
    %34 = vector.broadcast %cst_18 : f32 to vector<16x128xf32>
    %35 = arith.maximumf %33, %34 : vector<16x128xf32>
    %36 = arith.truncf %35 : vector<16x128xf32> to vector<16x128xbf16>
    %cst_19 = arith.constant dense<0.000000e+00> : vector<16x128xf32>
    %37 = tpu.matmul %10, %36, %cst_19 {dimension_numbers = #tpu.dot_dimension_numbers<[1], [0], [0], [1], [0, 0, 1, 1], [], []>} : vector<16x16xbf16>, vector<16x128xbf16>, vector<16x128xf32> -> vector<16x128xf32>
    %38 = arith.truncf %37 : vector<16x128xf32> to vector<16x128xbf16>
    %cst_20 = arith.constant dense<0.000000e+00> : vector<16x128xf32>
    %39 = tpu.matmul %17, %36, %cst_20 {dimension_numbers = #tpu.dot_dimension_numbers<[1], [0], [0], [1], [0, 0, 1, 1], [], []>} : vector<16x16xbf16>, vector<16x128xbf16>, vector<16x128xf32> -> vector<16x128xf32>
    %40 = arith.truncf %39 : vector<16x128xf32> to vector<16x128xbf16>
    %c0_21 = arith.constant 0 : index
    %c0_22 = arith.constant 0 : index
    %c0_23 = arith.constant 0 : index
    %41 = vector.load %arg3[%c0_21, %c0_22, %c0_23] : memref<3x128x128xbf16, #tpu.memory_space<vmem>>, vector<1x128x128xbf16>
    %42 = vector.shape_cast %41 : vector<1x128x128xbf16> to vector<128x128xbf16>
    %cst_24 = arith.constant dense<0.000000e+00> : vector<16x128xf32>
    %43 = tpu.matmul %38, %42, %cst_24 {dimension_numbers = #tpu.dot_dimension_numbers<[1], [0], [0], [1], [0, 0, 1, 1], [], []>} : vector<16x128xbf16>, vector<128x128xbf16>, vector<16x128xf32> -> vector<16x128xf32>
    %c1_25 = arith.constant 1 : index
    %c0_26 = arith.constant 0 : index
    %c0_27 = arith.constant 0 : index
    %44 = vector.load %arg3[%c1_25, %c0_26, %c0_27] : memref<3x128x128xbf16, #tpu.memory_space<vmem>>, vector<1x128x128xbf16>
    %45 = vector.shape_cast %44 : vector<1x128x128xbf16> to vector<128x128xbf16>
    %cst_28 = arith.constant dense<0.000000e+00> : vector<16x128xf32>
    %46 = tpu.matmul %36, %45, %cst_28 {dimension_numbers = #tpu.dot_dimension_numbers<[1], [0], [0], [1], [0, 0, 1, 1], [], []>} : vector<16x128xbf16>, vector<128x128xbf16>, vector<16x128xf32> -> vector<16x128xf32>
    %47 = arith.addf %43, %46 : vector<16x128xf32>
    %c2_29 = arith.constant 2 : index
    %c0_30 = arith.constant 0 : index
    %c0_31 = arith.constant 0 : index
    %48 = vector.load %arg3[%c2_29, %c0_30, %c0_31] : memref<3x128x128xbf16, #tpu.memory_space<vmem>>, vector<1x128x128xbf16>
    %49 = vector.shape_cast %48 : vector<1x128x128xbf16> to vector<128x128xbf16>
    %cst_32 = arith.constant dense<0.000000e+00> : vector<16x128xf32>
    %50 = tpu.matmul %40, %49, %cst_32 {dimension_numbers = #tpu.dot_dimension_numbers<[1], [0], [0], [1], [0, 0, 1, 1], [], []>} : vector<16x128xbf16>, vector<128x128xbf16>, vector<16x128xf32> -> vector<16x128xf32>
    %51 = arith.addf %47, %50 : vector<16x128xf32>
    %52 = arith.addf %51, %1 : vector<16x128xf32>
    %cst_33 = arith.constant 0.000000e+00 : f32
    %53 = vector.broadcast %cst_33 : f32 to vector<16x128xf32>
    %54 = arith.maximumf %52, %53 : vector<16x128xf32>
    %c0_34 = arith.constant 0 : index
    %c0_35 = arith.constant 0 : index
    %c0_36 = arith.constant 0 : index
    %55 = vector.load %arg4[%c0_34, %c0_35, %c0_36] : memref<1x16x128xf32, #tpu.memory_space<vmem>>, vector<1x16x128xf32>
    %56 = vector.shape_cast %55 : vector<1x16x128xf32> to vector<16x128xf32>
    %57 = vector.shape_cast %54 : vector<16x128xf32> to vector<1x16x128xf32>
    tpu.vector_store %arg4[%c0_34, %c0_35, %c0_36], %57 {strides = array<i32>} : memref<1x16x128xf32, #tpu.memory_space<vmem>>, vector<1x16x128xf32>,
    return
  }
  func.func @transform_0(%arg0: i32) -> (i32, i32, i32) {
    %c0_i32 = arith.constant 0 : i32
    %c0_i32_0 = arith.constant 0 : i32
    %c0_i32_1 = arith.constant 0 : i32
    return %arg0, %c0_i32, %c0_i32_0 : i32, i32, i32
  }
  func.func @transform_1(%arg0: i32) -> (i32, i32, i32) {
    %c0_i32 = arith.constant 0 : i32
    %c0_i32_0 = arith.constant 0 : i32
    %c0_i32_1 = arith.constant 0 : i32
    %c0_i32_2 = arith.constant 0 : i32
    return %c0_i32, %c0_i32_0, %c0_i32_1 : i32, i32, i32
  }
  func.func @transform_2(%arg0: i32) -> (i32, i32, i32) {
    %c0_i32 = arith.constant 0 : i32
    %c0_i32_0 = arith.constant 0 : i32
    %c0_i32_1 = arith.constant 0 : i32
    %c0_i32_2 = arith.constant 0 : i32
    return %c0_i32, %c0_i32_0, %c0_i32_1 : i32, i32, i32
  }
  func.func @transform_3(%arg0: i32) -> (i32, i32, i32) {
    %c0_i32 = arith.constant 0 : i32
    %c0_i32_0 = arith.constant 0 : i32
    %c0_i32_1 = arith.constant 0 : i32
    return %arg0, %c0_i32, %c0_i32_0 : i32, i32, i32
  }
}

</mosaic_0001>

<bundles_post_ra>
// kernel: quant_basic_block.1
= control target key start
LH: loop header
LB: loop body
LE: loop exit
PB: predicated region body
PF: predicated region fallthrough
CT: control target
= control target key end

     0   :  { %s1504_s12 = smov 0   ;;  %s1768_s0 = inlined_call_operand.vmem [shape: f32[2,16,128], index: 0, kind: input, shape index: {}]   ;;  %s1769_s1 = inlined_call_operand.vmem [shape: bf16[3,128,128], index: 1, kind: input, shape index: {}]   ;;  %s1770_s2 = inlined_call_operand.vmem [shape: bf16[3,128,128], index: 2, kind: input, shape index: {}]   ;;  %s1771_s3 = inlined_call_operand.vmem [shape: f32[2,16,128], index: 3, kind: output, shape index: {}]  }
   0x1 LB: > { %s1071_s13 = sadd.s32 4294967295, %s1480_s12   ;;  %p1075_p0 = scmp.ge.s32.totalorder %s1480_s12, 1  ;;  %s1480_s12 = sphi %s1504_s12, %s13_s12  }
   0x2   : > { %p137_p1 = scmp.lt.s32.totalorder %s1480_s12, 3 }
   0x4   : > { %p138_p2 = pnand %p1075_p0, %p137_p1 }
   0x5   : > { %p161_p3 = scmp.lt.s32.totalorder (!%p138_p2), %s1071_s13, 1  ;;  %v174_v0 = vlaneseq (!%p138_p2)  ;;  %v1482_v1 = vmov (!%p138_p2), 0.0   ;;  %vm1483_vm0 = vmmov (!%p138_p2), 0   ;;  %vm194_vm3 = vcmask (!%p138_p2), 130048   ;;  %v1426_v18 = vld [vmem:[%s1769_s1 + $0x40] sm:$0xff] (!%p138_p2)   ;;  %v1427_v19 = vld [vmem:[%s1769_s1 + $0x48] sm:$0xff] (!%p138_p2)  }
   0x6   : > { %141 = sbr.rel (%p138_p2) target bundleno = 960 (0x3c0), region = 32  ;;  %1264 = vmatprep.subr.bf16.mxu0 (!%p138_p2), %v1482_v1  ;;  %1266 = vmatprep.mubr.msk.bf16.mxu0 (!%p138_p2), %vm1483_vm0, %v1482_v1  ;;  %v1428_v20 = vld [vmem:[%s1769_s1 + $0x50] sm:$0xff] (!%p138_p2)   ;;  %v1429_v21 = vld [vmem:[%s1769_s1 + $0x58] sm:$0xff] (!%p138_p2)   ;;  %v1430_v22 = vld [vmem:[%s1769_s1 + $0x60] sm:$0xff] (!%p138_p2)  }
   0x7   : > { %v175_v2 = vshrl.u32 (!%p138_p2), %v174_v0, 7  ;;  %v178_v3 = vand.u32 (!%p138_p2), 127, %v174_v0  ;;  %1336 = vmatprep.subr.bf16.mxu1 (!%p138_p2), %v1482_v1  ;;  %1338 = vmatprep.mubr.msk.bf16.mxu1 (!%p138_p2), %vm1483_vm0, %v1482_v1  ;;  %v1431_v23 = vld [vmem:[%s1769_s1 + $0x68] sm:$0xff] (!%p138_p2)   ;;  %v1432_v24 = vld [vmem:[%s1769_s1 + $0x70] sm:$0xff] (!%p138_p2)   ;;  %v1433_v25 = vld [vmem:[%s1769_s1 + $0x78] sm:$0xff] (!%p138_p2)  }
   0x8   : > { %v1434_v26 = vld [vmem:[%s1769_s1] sm:$0xff] (!%p138_p2)   ;;  %v1435_v27 = vld [vmem:[%s1769_s1 + $0x8] sm:$0xff] (!%p138_p2)   ;;  %v1436_v28 = vld [vmem:[%s1769_s1 + $0x10] sm:$0xff] (!%p138_p2)  }
   0x9   : > { %v176_v4 = vadd.s32 (!%p138_p2), 8, %v175_v2  ;;  %v1080_v5 = vadd.s32 (!%p138_p2), 4294967295, %v175_v2  ;;  %v186_v6 = vadd.s32 (!%p138_p2), 1, %v175_v2  ;;  %v1437_v29 = vld [vmem:[%s1769_s1 + $0x18] sm:$0xff] (!%p138_p2)   ;;  %v1438_v30 = vld [vmem:[%s1769_s1 + $0x20] sm:$0xff] (!%p138_p2)   ;;  %v1439_v31 = vld [vmem:[%s1769_s1 + $0x28] sm:$0xff] (!%p138_p2)  }
   0xa   : > { %v1440_v32 = vld [vmem:[%s1769_s1 + $0x30] sm:$0xff] (!%p138_p2)   ;;  %v1441_v33 = vld [vmem:[%s1769_s1 + $0x38] sm:$0xff] (!%p138_p2)   ;;  %v1442_v37 = vld [vmem:[%s1769_s1 + $0x80] sm:$0xff] (!%p138_p2)  }
   0xb   : > { %v1081_v9 = vadd.s32 (!%p138_p2), 4294967295, %v176_v4  ;;  %vm181_vm1 = vcmp.eq.s32.totalorder (!%p138_p2), %v178_v3, %v1080_v5  ;;  %v187_v10 = vadd.s32 (!%p138_p2), 1, %v176_v4  ;;  %vm188_vm4 = vcmp.eq.s32.totalorder (!%p138_p2), %v178_v3, %v186_v6  ;;  %v1443_v40 = vld [vmem:[%s1769_s1 + $0x88] sm:$0xff] (!%p138_p2)   ;;  %v1444_v43 = vld [vmem:[%s1769_s1 + $0x90] sm:$0xff] (!%p138_p2)   ;;  %v1445_v47 = vld [vmem:[%s1769_s1 + $0x98] sm:$0xff] (!%p138_p2)  }
   0xc   : > { %v183_v12 = vsel (!%p138_p2), %vm181_vm1, 1.0, %v1482_v1  ;;  %v190_v15 = vsel (!%p138_p2), %vm188_vm4, 1.0, %v1482_v1  ;;  %v1446_v48 = vld [vmem:[%s1769_s1 + $0xa0] sm:$0xff] (!%p138_p2)   ;;  %v1447_v49 = vld [vmem:[%s1769_s1 + $0xa8] sm:$0xff] (!%p138_p2)   ;;  %v1448_v50 = vld [vmem:[%s1769_s1 + $0xb0] sm:$0xff] (!%p138_p2)  }
   0xd   : > { %s1773_s13 = smov (!%p161_p3, %s1071_s13), 1  ;;  %vm182_vm2 = vcmp.eq.s32.totalorder %v178_v3, %v1081_v9  ;;  %vm189_vm5 = vcmp.eq.s32.totalorder %v178_v3, %v187_v10  ;;  %v1449_v51 = vld [vmem:[%s1769_s1 + $0xb8] sm:$0xff]   ;;  %v1450_v59 = vld [vmem:[%s1770_s2 + $0x40] sm:$0xff]   ;;  %v1451_v60 = vld [vmem:[%s1770_s2 + $0x48] sm:$0xff]  }
   0xe   : > { %s1200_s14 = sshll.u32 %s1773_s13, 4  ;;  %v184_v13 = vsel %vm182_vm2, 1.0, %v1482_v1  ;;  %v191_v16 = vsel %vm189_vm5, 1.0, %v1482_v1  ;;  %v1452_v61 = vld [vmem:[%s1770_s2 + $0x50] sm:$0xff]   ;;  %v1453_v62 = vld [vmem:[%s1770_s2 + $0x58] sm:$0xff]   ;;  %v1454_v63 = vld [vmem:[%s1770_s2 + $0x60] sm:$0xff]  }
   0xf   : > { %s165_s17 = scalar_lea.vmem %s1768_s0, %s1200_s14  ;;  %v1534_v14 = vpack.c.bf16 %v184_v13, %v183_v12  ;;  %v1544_v17 = vpack.c.bf16 %v191_v16, %v190_v15  ;;  %v1455_v0 = vld [vmem:[%s1770_s2 + $0x68] sm:$0xff]   ;;  %v1456_v2 = vld [vmem:[%s1770_s2 + $0x70] sm:$0xff]   ;;  %v1457_v3 = vld [vmem:[%s1770_s2 + $0x78] sm:$0xff]   ;;  %s170_s20 = scalar_lea.vmem %s1771_s3, %s1200_s14 }
  0x10   : > { %v1526_v7 = vld [vmem:[%s165_s17] sm:$0xff]  ;;  %v1528_v8 = vld [vmem:[%s165_s17 + $0x8] sm:$0xff]  ;;  %v1460_v6 = vld [vmem:[%s1770_s2 + $0x10] sm:$0xff]  }
  0x11   : > { %v193_v11 = vpack.c.bf16 %v1528_v8, %v1526_v7  ;;  %v1458_v4 = vld [vmem:[%s1770_s2] sm:$0xff]   ;;  %v1459_v5 = vld [vmem:[%s1770_s2 + $0x8] sm:$0xff]   ;;  %v1461_v9 = vld [vmem:[%s1770_s2 + $0x18] sm:$0xff]  }
  0x12   : > { %v1462_v10 = vld [vmem:[%s1770_s2 + $0x20] sm:$0xff]   ;;  %v1464_v12 = vld [vmem:[%s1770_s2 + $0x30] sm:$0xff]   ;;  %v1465_v13 = vld [vmem:[%s1770_s2 + $0x38] sm:$0xff]  }
  0x13   : > { %1265 = vmatpush3.bf16.msra.mxu0 %v193_v11 }
  0x14   : > { %1270 = vmatprep.subr.bf16.mxu0 %v1482_v1 }
  0x16   : > { %1267 = vmatmul.mubr.msk.bf16.vlgmr.msra.gmra.mrb[0].mxu0 %vm194_vm3, %v1534_v14 }
  0x17   : > { %1271 = vmatpush3.bf16.msra.mxu0 %v193_v11  ;;  %1272 = vmatprep.mubr.msk.bf16.mxu0 %vm1483_vm0, %v1482_v1 }
  0x18   : > { %1276 = vmatprep.subr.bf16.mxu0 %v1482_v1 }
  0x1e   : > { %1273 = vmatmul.mubr.msk.bf16.vlgmr.msra.gmra.mrb[4].mxu0 %vm194_vm3, %v1544_v17 }
  0x1f   : > { %1277 = vmatpush3.bf16.msra.mxu0 %v1426_v18  ;;  %1292 = vmatprep.mubr.msk.bf16.mxu0 %vm1483_vm0, %v1482_v1 }
  0x20   : > { %1278 = vmatprep.subr.bf16.mxu0 %v1482_v1 }
  0x23   : > { %1279 = vmatpush3.bf16.msra.mxu0 %v1427_v19 }
  0x24   : > { %1280 = vmatprep.subr.bf16.mxu0 %v1482_v1 }
  0x27   : > { %1281 = vmatpush3.bf16.msra.mxu0 %v1428_v20  ;;  %v1467_v20 = vld [vmem:[%s1770_s2 + $0x88] sm:$0xff]  }
  0x28   : > { %1282 = vmatprep.subr.bf16.mxu0 %v1482_v1 }
  0x2b   : > { %1283 = vmatpush3.bf16.msra.mxu0 %v1429_v21 }
  0x2c   : > { %1284 = vmatprep.subr.bf16.mxu0 %v1482_v1 }
  0x2f   : > { %1285 = vmatpush3.bf16.msra.mxu0 %v1430_v22 }
  0x30   : > { %1286 = vmatprep.subr.bf16.mxu0 %v1482_v1 }
  0x33   : > { %1287 = vmatpush3.bf16.msra.mxu0 %v1431_v23  ;;  %v1468_v23 = vld [vmem:[%s1770_s2 + $0x90] sm:$0xff]  }
  0x34   : > { %1288 = vmatprep.subr.bf16.mxu0 %v1482_v1 }
  0x37   : > { %1289 = vmatpush3.bf16.msra.mxu0 %v1432_v24 }
  0x38   : > { %1290 = vmatprep.subr.bf16.mxu0 %v1482_v1 }
  0x3b   : > { %1291 = vmatpush3.bf16.msra.mxu0 %v1433_v25 }
  0x3c   : > { %1296 = vmatprep.subr.bf16.mxu0 %v1482_v1 }
  0x3e   : > { %1293 = vmatmul.mubr.bf16.vlgmr.msra.gmra.mrb[8].mxu0 %v193_v11  ;;  %v1463_v11 = vld [vmem:[%s1770_s2 + $0x28] sm:$0xff]  }
  0x3f   : > { %1297 = vmatpush3.bf16.msra.mxu0 %v1434_v26  ;;  %1312 = vmatprep.mubr.msk.bf16.mxu0 %vm1483_vm0, %v1482_v1 }
  0x40   : > { %1298 = vmatprep.subr.bf16.mxu0 %v1482_v1 }
  0x43   : > { %1299 = vmatpush3.bf16.msra.mxu0 %v1435_v27  ;;  %v1469_v27 = vld [vmem:[%s1770_s2 + $0x98] sm:$0xff]  }
  0x44   : > { %1300 = vmatprep.subr.bf16.mxu0 %v1482_v1 }
  0x47   : > { %1301 = vmatpush3.bf16.msra.mxu0 %v1436_v28  ;;  %v1470_v28 = vld [vmem:[%s1770_s2 + $0xa0] sm:$0xff]  }
  0x48   : > { %1302 = vmatprep.subr.bf16.mxu0 %v1482_v1 }
  0x4b   : > { %1303 = vmatpush3.bf16.msra.mxu0 %v1437_v29  ;;  %v1471_v29 = vld [vmem:[%s1770_s2 + $0xa8] sm:$0xff]  }
  0x4c   : > { %1304 = vmatprep.subr.bf16.mxu0 %v1482_v1 }
  0x4f   : > { %1305 = vmatpush3.bf16.msra.mxu0 %v1438_v30  ;;  %v1472_v30 = vld [vmem:[%s1770_s2 + $0xb0] sm:$0xff]  }
  0x50   : > { %1306 = vmatprep.subr.bf16.mxu0 %v1482_v1 }
  0x53   : > { %1307 = vmatpush3.bf16.msra.mxu0 %v1439_v31  ;;  %v1473_v31 = vld [vmem:[%s1770_s2 + $0xb8] sm:$0xff]  }
  0x54   : > { %1308 = vmatprep.subr.bf16.mxu0 %v1482_v1 }
  0x57   : > { %1309 = vmatpush3.bf16.msra.mxu0 %v1440_v32 }
  0x58   : > { %1310 = vmatprep.subr.bf16.mxu0 %v1482_v1 }
  0x5b   : > { %1311 = vmatpush3.bf16.msra.mxu0 %v1441_v33 }
  0x5c   : > { %1316 = vmatprep.subr.bf16.mxu0 %v1482_v1 }
  0xe9   : > { %v232_v34 = vpop.f32.mrb[0].mxu0 }
  0xea   : > { %v1268_v35 = vpop.f32.mrb[1].mxu0 }
  0xeb   : > { %v235_v36 = vpop.f32.mrb[2].mxu0 }
  0xec   : > { %v239_v38 = vpack.c.bf16 %v235_v36, %v232_v34  ;;  %v1269_v39 = vpop.f32.mrb[3].mxu0 }
  0xee   : > { %1313 = vmatmul.mubr.bf16.vlgmr.msra.gmra.mrb[8].mxu0 %v239_v38 }
  0xef   : > { %1317 = vmatpush3.bf16.msra.mxu0 %v1442_v37  ;;  %1332 = vmatprep.mubr.msk.bf16.mxu0 %vm1483_vm0, %v1482_v1 }
  0xf0   : > { %1318 = vmatprep.subr.bf16.mxu0 %v1482_v1 }
  0xf1   : > { %v277_v41 = vpop.f32.mrb[4].mxu0 }
  0xf2   : > { %v1274_v42 = vpop.f32.mrb[5].mxu0 }
  0xf3   : > { %1319 = vmatpush3.bf16.msra.mxu0 %v1443_v40  ;;  %v280_v44 = vpop.f32.mrb[6].mxu0 }
  0xf4   : > { %1320 = vmatprep.subr.bf16.mxu0 %v1482_v1  ;;  %v284_v45 = vpack.c.bf16 %v280_v44, %v277_v41  ;;  %v1275_v46 = vpop.f32.mrb[7].mxu0 }
  0xf7   : > { %1321 = vmatpush3.bf16.msra.mxu0 %v1444_v43 }
  0xf8   : > { %1322 = vmatprep.subr.bf16.mxu0 %v1482_v1 }
  0xfb   : > { %1323 = vmatpush3.bf16.msra.mxu0 %v1445_v47 }
  0xfc   : > { %1324 = vmatprep.subr.bf16.mxu0 %v1482_v1 }
  0xff   : > { %1325 = vmatpush3.bf16.msra.mxu0 %v1446_v48 }
 0x100   : > { %1326 = vmatprep.subr.bf16.mxu0 %v1482_v1 }
 0x103   : > { %1327 = vmatpush3.bf16.msra.mxu0 %v1447_v49 }
 0x104   : > { %1328 = vmatprep.subr.bf16.mxu0 %v1482_v1 }
 0x107   : > { %1329 = vmatpush3.bf16.msra.mxu0 %v1448_v50 }
 0x108   : > { %1330 = vmatprep.subr.bf16.mxu0 %v1482_v1 }
 0x10b   : > { %1331 = vmatpush3.bf16.msra.mxu0 %v1449_v51 }
 0x10e   : > { %1333 = vmatmul.mubr.bf16.vlgmr.msra.gmra.mrb[8].mxu0 %v284_v45 }
 0x1e1   : > { %v595_v52 = vpop.f32.mrb[8].mxu0 }
 0x1e2   : > { %v1334_v53 = vpop.f32.mrb[9].mxu0  ;;  %v604_v55 = vmax.f32 %v595_v52, 0.0 }
 0x1e3   : > { %v598_v54 = vpop.f32.mrb[10].mxu0 }
 0x1e4   : > { %v605_v56 = vmax.f32 %v598_v54, 0.0  ;;  %v1335_v57 = vpop.f32.mrb[11].mxu0 }
 0x1e6   : > { %v606_v58 = vpack.c.bf16 %v605_v56, %v604_v55 }
 0x1e8   : > { %1337 = vmatpush3.bf16.msra.mxu1 %v606_v58 }
 0x1e9   : > { %1342 = vmatprep.subr.bf16.mxu1 %v1482_v1 }
 0x1eb   : > { %1339 = vmatmul.mubr.msk.bf16.vlgmr.msra.gmra.mrb[0].mxu1 %vm194_vm3, %v1534_v14 }
 0x1ec   : > { %1343 = vmatpush3.bf16.msra.mxu1 %v606_v58  ;;  %1344 = vmatprep.mubr.msk.bf16.mxu1 %vm1483_vm0, %v1482_v1 }
 0x1ed   : > { %1348 = vmatprep.subr.bf16.mxu1 %v1482_v1 }
 0x1f3   : > { %1345 = vmatmul.mubr.msk.bf16.vlgmr.msra.gmra.mrb[4].mxu1 %vm194_vm3, %v1544_v17  ;;  %v1466_v17 = vld [vmem:[%s1770_s2 + $0x80] sm:$0xff]  }
 0x1f4   : > { %1349 = vmatpush3.bf16.msra.mxu1 %v1450_v59  ;;  %1364 = vmatprep.mubr.msk.bf16.mxu1 %vm1483_vm0, %v1482_v1 }
 0x1f5   : > { %1350 = vmatprep.subr.bf16.mxu1 %v1482_v1 }
 0x1f8   : > { %1351 = vmatpush3.bf16.msra.mxu1 %v1451_v60 }
 0x1f9   : > { %1352 = vmatprep.subr.bf16.mxu1 %v1482_v1 }
 0x1fc   : > { %1353 = vmatpush3.bf16.msra.mxu1 %v1452_v61 }
 0x1fd   : > { %1354 = vmatprep.subr.bf16.mxu1 %v1482_v1 }
 0x200   : > { %1355 = vmatpush3.bf16.msra.mxu1 %v1453_v62 }
 0x201   : > { %1356 = vmatprep.subr.bf16.mxu1 %v1482_v1 }
 0x204   : > { %1357 = vmatpush3.bf16.msra.mxu1 %v1454_v63 }
 0x205   : > { %1358 = vmatprep.subr.bf16.mxu1 %v1482_v1 }
 0x208   : > { %1359 = vmatpush3.bf16.msra.mxu1 %v1455_v0 }
 0x209   : > { %1360 = vmatprep.subr.bf16.mxu1 %v1482_v1 }
 0x20c   : > { %1361 = vmatpush3.bf16.msra.mxu1 %v1456_v2 }
 0x20d   : > { %1362 = vmatprep.subr.bf16.mxu1 %v1482_v1 }
 0x210   : > { %1363 = vmatpush3.bf16.msra.mxu1 %v1457_v3 }
 0x211   : > { %1368 = vmatprep.subr.bf16.mxu1 %v1482_v1 }
 0x213   : > { %1365 = vmatmul.mubr.bf16.vlgmr.msra.gmra.mrb[8].mxu1 %v606_v58 }
 0x214   : > { %1369 = vmatpush3.bf16.msra.mxu1 %v1458_v4  ;;  %1384 = vmatprep.mubr.msk.bf16.mxu1 %vm1483_vm0, %v1482_v1 }
 0x215   : > { %1370 = vmatprep.subr.bf16.mxu1 %v1482_v1 }
 0x218   : > { %1371 = vmatpush3.bf16.msra.mxu1 %v1459_v5 }
 0x219   : > { %1372 = vmatprep.subr.bf16.mxu1 %v1482_v1 }
 0x21c   : > { %1373 = vmatpush3.bf16.msra.mxu1 %v1460_v6 }
 0x21d   : > { %1374 = vmatprep.subr.bf16.mxu1 %v1482_v1 }
 0x220   : > { %1375 = vmatpush3.bf16.msra.mxu1 %v1461_v9 }
 0x221   : > { %1376 = vmatprep.subr.bf16.mxu1 %v1482_v1 }
 0x224   : > { %1377 = vmatpush3.bf16.msra.mxu1 %v1462_v10 }
 0x225   : > { %1378 = vmatprep.subr.bf16.mxu1 %v1482_v1 }
 0x228   : > { %1379 = vmatpush3.bf16.msra.mxu1 %v1463_v11 }
 0x229   : > { %1380 = vmatprep.subr.bf16.mxu1 %v1482_v1 }
 0x22c   : > { %1381 = vmatpush3.bf16.msra.mxu1 %v1464_v12 }
 0x22d   : > { %1382 = vmatprep.subr.bf16.mxu1 %v1482_v1 }
 0x230   : > { %1383 = vmatpush3.bf16.msra.mxu1 %v1465_v13 }
 0x231   : > { %1388 = vmatprep.subr.bf16.mxu1 %v1482_v1 }
 0x2be   : > { %v641_v14 = vpop.f32.mrb[0].mxu1 }
 0x2bf   : > { %v1340_v15 = vpop.f32.mrb[1].mxu1 }
 0x2c0   : > { %v644_v16 = vpop.f32.mrb[2].mxu1 }
 0x2c1   : > { %v648_v18 = vpack.c.bf16 %v644_v16, %v641_v14  ;;  %v1341_v19 = vpop.f32.mrb[3].mxu1 }
 0x2c3   : > { %1385 = vmatmul.mubr.bf16.vlgmr.msra.gmra.mrb[12].mxu1 %v648_v18 }
 0x2c4   : > { %1389 = vmatpush3.bf16.msra.mxu1 %v1466_v17  ;;  %1404 = vmatprep.mubr.msk.bf16.mxu1 %vm1483_vm0, %v1482_v1 }
 0x2c5   : > { %1390 = vmatprep.subr.bf16.mxu1 %v1482_v1 }
 0x2c6   : > { %v683_v21 = vpop.f32.mrb[4].mxu1 }
 0x2c7   : > { %v1346_v22 = vpop.f32.mrb[5].mxu1 }
 0x2c8   : > { %1391 = vmatpush3.bf16.msra.mxu1 %v1467_v20  ;;  %v686_v24 = vpop.f32.mrb[6].mxu1 }
 0x2c9   : > { %1392 = vmatprep.subr.bf16.mxu1 %v1482_v1  ;;  %v690_v25 = vpack.c.bf16 %v686_v24, %v683_v21  ;;  %v1347_v26 = vpop.f32.mrb[7].mxu1 }
 0x2cc   : > { %1393 = vmatpush3.bf16.msra.mxu1 %v1468_v23 }
 0x2cd   : > { %1394 = vmatprep.subr.bf16.mxu1 %v1482_v1 }
 0x2d0   : > { %1395 = vmatpush3.bf16.msra.mxu1 %v1469_v27 }
 0x2d1   : > { %1396 = vmatprep.subr.bf16.mxu1 %v1482_v1 }
 0x2d4   : > { %1397 = vmatpush3.bf16.msra.mxu1 %v1470_v28 }
 0x2d5   : > { %1398 = vmatprep.subr.bf16.mxu1 %v1482_v1 }
 0x2d8   : > { %1399 = vmatpush3.bf16.msra.mxu1 %v1471_v29 }
 0x2d9   : > { %1400 = vmatprep.subr.bf16.mxu1 %v1482_v1 }
 0x2dc   : > { %1401 = vmatpush3.bf16.msra.mxu1 %v1472_v30 }
 0x2dd   : > { %1402 = vmatprep.subr.bf16.mxu1 %v1482_v1 }
 0x2e0   : > { %1403 = vmatpush3.bf16.msra.mxu1 %v1473_v31 }
 0x2e3   : > { %1405 = vmatmul.mubr.bf16.vlgmr.msra.gmra.mrb[16].mxu1 %v690_v25 }
 0x2e6   : > { %v806_v32 = vpop.f32.mrb[8].mxu1 }
 0x2e7   : > { %v1366_v33 = vpop.f32.mrb[9].mxu1 }
 0x2e8   : > { %v809_v34 = vpop.f32.mrb[10].mxu1 }
 0x2e9   : > { %v1367_v35 = vpop.f32.mrb[11].mxu1 }
 0x396   : > { %v895_v36 = vpop.f32.mrb[12].mxu1 }
 0x397   : > { %v896_v37 = vadd.f32 %v895_v36, %v806_v32  ;;  %v1386_v38 = vpop.f32.mrb[13].mxu1 }
 0x398   : > { %v898_v39 = vpop.f32.mrb[14].mxu1 }
 0x399   : > { %v899_v40 = vadd.f32 %v898_v39, %v809_v34  ;;  %v1387_v41 = vpop.f32.mrb[15].mxu1 }
 0x3b6   : > { %v1001_v42 = vpop.f32.mrb[16].mxu1 }
 0x3b7   : > { %v1008_v43 = vadd.f32 %v1001_v42, %v896_v37  ;;  %v1406_v44 = vpop.f32.mrb[17].mxu1 }
 0x3b8   : > { %v1004_v45 = vpop.f32.mrb[18].mxu1 }
 0x3b9   : > { %v1010_v46 = vadd.f32 %v1008_v43, %v1526_v7  ;;  %v1009_v1 = vadd.f32 %v1004_v45, %v899_v40  ;;  %v1407_v47 = vpop.f32.mrb[19].mxu1 }
 0x3bb   : > { %v1012_v48 = vmax.f32 %v1010_v46, 0.0  ;;  %v1011_v49 = vadd.f32 %v1009_v1, %v1528_v8 }
 0x3bd   : > { %1014 = vst [vmem:[%s170_s20] sm:$0xff] %v1012_v48  ;;  %v1013_v50 = vmax.f32 %v1011_v49, 0.0 }
 0x3bf   : > { %1015 = vst [vmem:[%s170_s20 + $0x8] sm:$0xff] %v1013_v50 }
 0x3c0 PF: > { %s13_s12 = sadd.s32 1, %s1480_s12  }
 0x3c1   : > { %p10_p4 = scmp.ge.s32.totalorder %s13_s12, 4  }
 0x3c3   :  { %12 = sbr.rel (!%p10_p4) target bundleno = 1 (0x1), region = 66 }

</bundles_post_ra>
